<compile_context>
chip_gen: v5e
topology: v5e:2x2
jax: 0.10.0
libtpu: 0.0.40
codegen_flags: <defaults>
</compile_context>

<pallas_src>
import math
import jax
import jax.numpy as jnp
from jax.experimental import pallas as pl
from jax.experimental.pallas import tpu as pltpu

EPS = 1e-07
NEG_SLOPE = 0.01          # F.leaky_relu default negative slope
LANE = 128
SUBLANE = 8


def _round_up(x, m):
    return ((x + m - 1) // m) * m


def _spacial_conv_kernel(pos_src_ref, pos_dst_ref, h_src_ref, dst_ref,
                         inv_deg_ref, h_dst_ref, rep_ref, w_sp_ref, b_sp_ref,
                         w_ne_ref, b_ne_ref, w_self_ref, bias_ref,
                         out_ref, acc_ref):
    n_blk = pl.program_id(0)
    e_blk = pl.program_id(1)
    n_tile = acc_ref.shape[0]
    e_tile = pos_src_ref.shape[0]

    # ---- zero the accumulator at the start of each E sweep ------------------
    @pl.when(e_blk == 0)
    def _():
        acc_ref[...] = jnp.zeros_like(acc_ref)

    # ---- per-edge spatial weights (VPU + EUP) --------------------------------
    rel = pos_dst_ref[...] - pos_src_ref[...]                        # (E_T, C)
    norm = jnp.sqrt(jnp.sum(rel * rel, axis=-1, keepdims=True))      # (E_T, 1)
    inv = pl.reciprocal(norm + EPS, approx=True)                     # EUP slot
    ws = (rel + 1.0) * inv                                           # (E_T, C)
    ss = jnp.dot(ws, w_sp_ref[...],
                 preferred_element_type=jnp.float32) + b_sp_ref[...]  # (E_T, FH)
    ss = jnp.where(ss >= 0.0, ss, NEG_SLOPE * ss)                    # leaky_relu
    # h_src (E_T, F) -> lane-dense (E_T, F*H) via constant repeat matrix
    h_rep = jnp.dot(h_src_ref[...], rep_ref[...],
                    preferred_element_type=jnp.float32)              # (E_T, FH)
    e_sp = ss * h_rep                                                # (E_T, FH)

    # ---- aggregation: 0/1 incidence block built on the fly, bf16 MXU --------
    row_ids = (jax.lax.broadcasted_iota(jnp.int32, (n_tile, e_tile), 0)
               + n_blk * n_tile)
    onehot = (dst_ref[...] == row_ids).astype(jnp.bfloat16)          # (N_T, E_T)
    acc_ref[...] += jnp.dot(onehot, e_sp.astype(jnp.bfloat16),
                            preferred_element_type=jnp.float32)      # (N_T, FH)

    # ---- epilogue: once per output tile --------------------------------------
    @pl.when(e_blk == pl.num_programs(1) - 1)
    def _():
        neigh = acc_ref[...] * inv_deg_ref[...]                      # mean agg
        h_neigh = jnp.dot(neigh, w_ne_ref[...],
                          preferred_element_type=jnp.float32) + b_ne_ref[...]
        h_self = jnp.dot(h_dst_ref[...], w_self_ref[...],
                         preferred_element_type=jnp.float32)
        out_ref[...] = (h_self + h_neigh + bias_ref[...]).astype(out_ref.dtype)


def spacial_conv(h, pos, src_idx, dst_idx, params, hidden,
                 *, e_tile=128, n_tile_cap=512):
    """Gathers per-edge operands in XLA, then runs the fused Pallas kernel."""
    n_nodes, in_feats = h.shape
    coors = pos.shape[1]
    n_edges = src_idx.shape[0]
    out_feats = params["w_self"].shape[1]
    fh = hidden * in_feats
    f32 = jnp.float32

    # lane-dense padding of feature dims (no-op once they are 128-multiples)
    fh_p = _round_up(fh, LANE)
    o_p = _round_up(out_feats, LANE)

    # tile sizes: e_tile multiple of 128 (dst-id lane constraint), n_tile of 8.
    e_tile = max(LANE, min(_round_up(e_tile, LANE), _round_up(n_edges, LANE)))
    e_pad = _round_up(n_edges, e_tile)
    n_tile = max(SUBLANE, min(_round_up(n_nodes, SUBLANE), n_tile_cap))
    n_pad = _round_up(n_nodes, n_tile)

    # ---- per-edge operands (padded edges get dst=-1 -> contribute nothing) ---
    pe = e_pad - n_edges
    pos_src = jnp.pad(pos[src_idx].astype(f32), ((0, pe), (0, 0)))
    pos_dst = jnp.pad(pos[dst_idx].astype(f32), ((0, pe), (0, 0)),
                      constant_values=1.0)        # keep padded norms finite
    h_src = jnp.pad(h[src_idx].astype(f32), ((0, pe), (0, 0)))
    dst_ids = jnp.pad(dst_idx.astype(jnp.int32), (0, pe),
                      constant_values=-1).reshape(1, e_pad)

    # ---- per-node operands ----------------------------------------------------
    deg = jnp.zeros((n_nodes,), f32).at[dst_idx].add(1.0)
    inv_deg = 1.0 / jnp.maximum(deg, 1.0)          # isolated nodes -> 0 neigh
    inv_deg = jnp.pad(inv_deg, (0, n_pad - n_nodes),
                      constant_values=1.0).reshape(n_pad, 1)
    h_dst = jnp.pad(h.astype(f32), ((0, n_pad - n_nodes), (0, 0)))

    # ---- weights (zero-padded to lane-dense shapes) ---------------------------
    rep = (jnp.arange(fh)[None, :] // hidden ==
           jnp.arange(in_feats)[:, None]).astype(f32)          # (F, F*H)
    rep = jnp.pad(rep, ((0, 0), (0, fh_p - fh)))
    w_sp = jnp.pad(params["w_sp"].astype(f32), ((0, 0), (0, fh_p - fh)))
    b_sp = jnp.pad(params["b_sp"].astype(f32), ((0, 0), (0, fh_p - fh)))
    w_ne = jnp.pad(params["w_ne"].astype(f32),
                   ((0, fh_p - fh), (0, o_p - out_feats)))
    b_ne = jnp.pad(params["b_ne"].astype(f32), ((0, 0), (0, o_p - out_feats)))
    w_self = jnp.pad(params["w_self"].astype(f32),
                     ((0, 0), (0, o_p - out_feats)))
    bias = jnp.pad(params["bias"].astype(f32), ((0, 0), (0, o_p - out_feats)))

    grid = (n_pad // n_tile, e_pad // e_tile)

    edge_spec = lambda shape: pl.BlockSpec(shape, lambda n, e: (e, 0))
    node_spec = lambda shape: pl.BlockSpec(shape, lambda n, e: (n, 0))
    full_spec = lambda shape: pl.BlockSpec(shape, lambda n, e: (0, 0))

    flops = (2 * n_pad * e_pad * fh_p                              # aggregation
             + grid[0] * e_pad * 2 * (coors + in_feats) * fh_p     # edge MLP+expand
             + 2 * n_pad * (fh_p + in_feats) * o_p)                # projections
    bytes_accessed = int(
        sum(int(x.size) * 4 for x in (pos_src, pos_dst, h_src, h_dst, inv_deg,
                                      rep, w_sp, b_sp, w_ne, b_ne, w_self, bias))
        + int(dst_ids.size) * 4 + n_pad * o_p * 4)
    cost = pl.CostEstimate(flops=int(flops),
                           transcendentals=int(2 * grid[0] * e_pad),
                           bytes_accessed=bytes_accessed)

    out = pl.pallas_call(
        _spacial_conv_kernel,
        out_shape=jax.ShapeDtypeStruct((n_pad, o_p), f32),
        grid_spec=pltpu.PrefetchScalarGridSpec(
            num_scalar_prefetch=0,
            grid=grid,
            in_specs=[
                edge_spec((e_tile, coors)),                     # pos_src
                edge_spec((e_tile, coors)),                     # pos_dst
                edge_spec((e_tile, in_feats)),                  # h_src
                pl.BlockSpec((1, e_tile), lambda n, e: (0, e)),  # dst ids
                node_spec((n_tile, 1)),                         # 1/deg
                node_spec((n_tile, in_feats)),                  # h (dst/self)
                full_spec((in_feats, fh_p)),                    # repeat matrix
                full_spec((coors, fh_p)),                       # w_spatial
                full_spec((1, fh_p)),                           # b_spatial
                full_spec((fh_p, o_p)),                         # w_neigh
                full_spec((1, o_p)),                            # b_neigh
                full_spec((in_feats, o_p)),                     # w_self
                full_spec((1, o_p)),                            # bias
            ],
            out_specs=pl.BlockSpec((n_tile, o_p), lambda n, e: (n, 0)),
            scratch_shapes=[pltpu.VMEM((n_tile, fh_p), jnp.float32)],
        ),
        compiler_params=pltpu.CompilerParams(
            dimension_semantics=("parallel", "arbitrary"),  # N parallel, E reduce
            vmem_limit_bytes=48 * 1024 * 1024,              # safe on v5e/v6e/v7x
        ),
        cost_estimate=cost,
    )(pos_src, pos_dst, h_src, dst_ids, inv_deg, h_dst,
      rep, w_sp, b_sp, w_ne, b_ne, w_self, bias)

    return out[:n_nodes, :out_feats]


# ----------------------------------------------------------------------------
# Parameter init (deterministic, mirrors the module's reset_parameters)
# ----------------------------------------------------------------------------
def xavier_uniform(key, fan_in, fan_out, gain):
    a = gain * math.sqrt(6.0 / (fan_in + fan_out))
    return jax.random.uniform(key, (fan_in, fan_out), jnp.float32, -a, a)


def init_params(key, coors, in_feats, out_feats, hidden):
    gain = math.sqrt(2.0 / (1.0 + NEG_SLOPE ** 2))   # calculate_gain('leaky_relu')
    k = jax.random.split(key, 5)
    w_self = xavier_uniform(k[0], in_feats, out_feats, gain)          # [F, O]
    w_sp = xavier_uniform(k[1], coors, hidden * in_feats, gain)       # [C, F*H]
    b_sp = jax.random.uniform(k[2], (1, hidden * in_feats), jnp.float32,
                              -1.0 / math.sqrt(coors), 1.0 / math.sqrt(coors))
    w_ne = xavier_uniform(k[3], hidden * in_feats, out_feats, gain)   # [F*H, O]
    b_ne = jax.random.uniform(k[4], (1, out_feats), jnp.float32,
                              -1.0 / math.sqrt(hidden * in_feats),
                              1.0 / math.sqrt(hidden * in_feats))
    bias = jnp.zeros((1, out_feats), jnp.float32)
    return dict(w_self=w_self, w_sp=w_sp, b_sp=b_sp,
                w_ne=w_ne, b_ne=b_ne, bias=bias)


def spacial_conv_reference(h, pos, src_idx, dst_idx, params, hidden):
    """Pure-JAX reference (mirrors the PyTorch forward exactly, all f32)."""
    n_nodes, in_feats = h.shape
    rel = pos[dst_idx] - pos[src_idx]
    scal = jnp.linalg.norm(rel, axis=1, keepdims=True) + EPS
    ws = (rel + 1.0) / scal
    ss = ws @ params["w_sp"] + params["b_sp"]
    ss = jnp.where(ss >= 0.0, ss, NEG_SLOPE * ss)
    e = (ss.reshape(-1, in_feats, hidden) * h[src_idx][:, :, None]
         ).reshape(ss.shape[0], -1)
    onehot_dst = jax.nn.one_hot(dst_idx, n_nodes, dtype=jnp.float32)
    deg = jnp.maximum(jnp.sum(onehot_dst, axis=0), 1.0)
    neigh = (onehot_dst.T @ e) / deg[:, None]
    h_neigh = neigh @ params["w_ne"] + params["b_ne"]
    return h @ params["w_self"] + h_neigh + params["bias"]


if __name__ == "__main__":
    N_NODES, N_EDGES = 16, 256
    COORS, IN_FEATS, OUT_FEATS, HIDDEN = 3, 8, 16, 4

    key = jax.random.PRNGKey(0)
    kh, kp, ks, kd, kw = jax.random.split(key, 5)
    h = jax.random.normal(kh, (N_NODES, IN_FEATS), jnp.float32)
    pos = jax.random.normal(kp, (N_NODES, COORS), jnp.float32)
    src_idx = jax.random.randint(ks, (N_EDGES,), 0, N_NODES)
    # avoid self-loops so ||rel_pos|| stays well conditioned for the bf16 path
    dst_idx = (src_idx + jax.random.randint(kd, (N_EDGES,), 1, N_NODES)) % N_NODES
    params = init_params(kw, COORS, IN_FEATS, OUT_FEATS, HIDDEN)

    out = spacial_conv(h, pos, src_idx, dst_idx, params, HIDDEN, e_tile=128)
    jax.block_until_ready(out)

    ref = spacial_conv_reference(h, pos, src_idx, dst_idx, params, HIDDEN)
    assert out.shape == (N_NODES, OUT_FEATS)
    # bf16 aggregation matmul (f32 accumulate) + approx reciprocal -> ~1e-2 tol
    err = float(jnp.max(jnp.abs(out - ref)))
    scale = float(jnp.max(jnp.abs(ref))) + 1e-6
    assert err <= 3e-2 * scale + 3e-2, (err, scale)
    print("KERNEL_OK")
</pallas_src>

<mosaic_0001>
module attributes {stable_mosaic.version = 11 : i64} {
  func.func @_spacial_conv_kernel(%arg0: i32, %arg1: i32, %arg2: memref<128x3xf32, #tpu.memory_space<vmem>>, %arg3: memref<128x3xf32, #tpu.memory_space<vmem>>, %arg4: memref<128x8xf32, #tpu.memory_space<vmem>>, %arg5: memref<1x128xi32, #tpu.memory_space<vmem>>, %arg6: memref<16x1xf32, #tpu.memory_space<vmem>>, %arg7: memref<16x8xf32, #tpu.memory_space<vmem>>, %arg8: memref<8x128xf32, #tpu.memory_space<vmem>>, %arg9: memref<3x128xf32, #tpu.memory_space<vmem>>, %arg10: memref<1x128xf32, #tpu.memory_space<vmem>>, %arg11: memref<128x128xf32, #tpu.memory_space<vmem>>, %arg12: memref<1x128xf32, #tpu.memory_space<vmem>>, %arg13: memref<8x128xf32, #tpu.memory_space<vmem>>, %arg14: memref<1x128xf32, #tpu.memory_space<vmem>>, %arg15: memref<16x128xf32, #tpu.memory_space<vmem>>, %arg16: memref<16x128xf32, #tpu.memory_space<vmem>>) attributes {dimension_semantics = [#tpu.dimension_semantics<parallel>, #tpu.dimension_semantics<arbitrary>], iteration_bounds = array<i64: 1, 2>, scalar_prefetch = 0 : i64, scratch_operands = 1 : i64, tpu.core_type = #tpu.core_type<tc>, window_params = [{transform_indices = @transform_0, window_bounds = array<i64: 128, 3>}, {transform_indices = @transform_1, window_bounds = array<i64: 128, 3>}, {transform_indices = @transform_2, window_bounds = array<i64: 128, 8>}, {transform_indices = @transform_3, window_bounds = array<i64: 1, 128>}, {transform_indices = @transform_4, window_bounds = array<i64: 16, 1>}, {transform_indices = @transform_5, window_bounds = array<i64: 16, 8>}, {pipeline_mode = #tpu.pipeline_mode<synchronous>, transform_indices = @transform_6, window_bounds = array<i64: 8, 128>}, {pipeline_mode = #tpu.pipeline_mode<synchronous>, transform_indices = @transform_7, window_bounds = array<i64: 3, 128>}, {pipeline_mode = #tpu.pipeline_mode<synchronous>, transform_indices = @transform_8, window_bounds = array<i64: 1, 128>}, {pipeline_mode = #tpu.pipeline_mode<synchronous>, transform_indices = @transform_9, window_bounds = array<i64: 128, 128>}, {pipeline_mode = #tpu.pipeline_mode<synchronous>, transform_indices = @transform_10, window_bounds = array<i64: 1, 128>}, {pipeline_mode = #tpu.pipeline_mode<synchronous>, transform_indices = @transform_11, window_bounds = array<i64: 8, 128>}, {pipeline_mode = #tpu.pipeline_mode<synchronous>, transform_indices = @transform_12, window_bounds = array<i64: 1, 128>}, {transform_indices = @transform_13, window_bounds = array<i64: 16, 128>}]} {
    %c0_i32 = arith.constant 0 : i32
    %0 = arith.cmpi eq, %arg1, %c0_i32 : i32
    %1 = arith.extui %0 : i1 to i32
    %c0_i32_0 = arith.constant 0 : i32
    %2 = arith.cmpi ne, %1, %c0_i32_0 : i32
    scf.if %2 {
      %cst_26 = arith.constant 0.000000e+00 : f32
      %49 = vector.broadcast %cst_26 : f32 to vector<16x128xf32>
      %c0_27 = arith.constant 0 : index
      %c0_28 = arith.constant 0 : index
      %50 = vector.load %arg16[%c0_27, %c0_28] : memref<16x128xf32, #tpu.memory_space<vmem>>, vector<16x128xf32>
      tpu.vector_store %arg16[%c0_27, %c0_28], %49 {strides = array<i32>} : memref<16x128xf32, #tpu.memory_space<vmem>>, vector<16x128xf32>,
    } else {
    }
    %c0 = arith.constant 0 : index
    %c0_1 = arith.constant 0 : index
    %3 = vector.load %arg3[%c0, %c0_1] : memref<128x3xf32, #tpu.memory_space<vmem>>, vector<128x3xf32>
    %c0_2 = arith.constant 0 : index
    %c0_3 = arith.constant 0 : index
    %4 = vector.load %arg2[%c0_2, %c0_3] : memref<128x3xf32, #tpu.memory_space<vmem>>, vector<128x3xf32>
    %5 = arith.subf %3, %4 : vector<128x3xf32>
    %6 = arith.mulf %5, %5 : vector<128x3xf32>
    %cst = arith.constant dense<0.000000e+00> : vector<128xf32>
    %7 = vector.multi_reduction <add>, %6, %cst [1] : vector<128x3xf32> to vector<128xf32>
    %8 = vector.shape_cast %7 : vector<128xf32> to vector<128x1xf32>
    %9 = math.sqrt %8 : vector<128x1xf32>
    %cst_4 = arith.constant 1.000000e-07 : f32
    %10 = vector.broadcast %cst_4 : f32 to vector<128x1xf32>
    %11 = arith.addf %9, %10 : vector<128x1xf32>
    %12 = tpu.reciprocal %11 {approx = true} : vector<128x1xf32> -> vector<128x1xf32>
    %cst_5 = arith.constant 1.000000e+00 : f32
    %13 = vector.broadcast %cst_5 : f32 to vector<128x3xf32>
    %14 = arith.addf %5, %13 : vector<128x3xf32>
    %15 = vector.broadcast %12 : vector<128x1xf32> to vector<128x3xf32>
    %16 = arith.mulf %14, %15 : vector<128x3xf32>
    %c0_6 = arith.constant 0 : index
    %c0_7 = arith.constant 0 : index
    %17 = vector.load %arg9[%c0_6, %c0_7] : memref<3x128xf32, #tpu.memory_space<vmem>>, vector<3x128xf32>
    %cst_8 = arith.constant dense<0.000000e+00> : vector<128x128xf32>
    %18 = tpu.matmul %16, %17, %cst_8 {dimension_numbers = #tpu.dot_dimension_numbers<[1], [0], [0], [1], [0, 0, 1, 1], [], []>} : vector<128x3xf32>, vector<3x128xf32>, vector<128x128xf32> -> vector<128x128xf32>
    %c0_9 = arith.constant 0 : index
    %c0_10 = arith.constant 0 : index
    %19 = vector.load %arg10[%c0_9, %c0_10] : memref<1x128xf32, #tpu.memory_space<vmem>>, vector<1x128xf32>
    %20 = vector.broadcast %19 : vector<1x128xf32> to vector<128x128xf32>
    %21 = arith.addf %18, %20 : vector<128x128xf32>
    %cst_11 = arith.constant 0.000000e+00 : f32
    %22 = vector.broadcast %cst_11 : f32 to vector<128x128xf32>
    %23 = arith.cmpf oge, %21, %22 : vector<128x128xf32>
    %cst_12 = arith.constant 0.00999999977 : f32
    %24 = vector.broadcast %cst_12 : f32 to vector<128x128xf32>
    %25 = arith.mulf %24, %21 : vector<128x128xf32>
    %26 = arith.select %23, %21, %25 : vector<128x128xi1>, vector<128x128xf32>
    %c0_13 = arith.constant 0 : index
    %c0_14 = arith.constant 0 : index
    %27 = vector.load %arg4[%c0_13, %c0_14] : memref<128x8xf32, #tpu.memory_space<vmem>>, vector<128x8xf32>
    %c0_15 = arith.constant 0 : index
    %c0_16 = arith.constant 0 : index
    %28 = vector.load %arg8[%c0_15, %c0_16] : memref<8x128xf32, #tpu.memory_space<vmem>>, vector<8x128xf32>
    %cst_17 = arith.constant dense<0.000000e+00> : vector<128x128xf32>
    %29 = tpu.matmul %27, %28, %cst_17 {dimension_numbers = #tpu.dot_dimension_numbers<[1], [0], [0], [1], [0, 0, 1, 1], [], []>} : vector<128x8xf32>, vector<8x128xf32>, vector<128x128xf32> -> vector<128x128xf32>
    %30 = arith.mulf %26, %29 : vector<128x128xf32>
    %31 = tpu.iota {dimensions = array<i32: 0>} : vector<16x128xi32>
    %c16_i32 = arith.constant 16 : i32
    %32 = arith.muli %arg0, %c16_i32 : i32
    %33 = vector.broadcast %32 : i32 to vector<16x128xi32>
    %34 = arith.addi %31, %33 : vector<16x128xi32>
    %c0_18 = arith.constant 0 : index
    %c0_19 = arith.constant 0 : index
    %35 = vector.load %arg5[%c0_18, %c0_19] : memref<1x128xi32, #tpu.memory_space<vmem>>, vector<1x128xi32>
    %36 = vector.broadcast %35 : vector<1x128xi32> to vector<16x128xi32>
    %37 = arith.cmpi eq, %36, %34 : vector<16x128xi32>
    %38 = arith.extui %37 : vector<16x128xi1> to vector<16x128xi32>
    %39 = arith.sitofp %38 : vector<16x128xi32> to vector<16x128xf32>
    %40 = arith.truncf %39 : vector<16x128xf32> to vector<16x128xbf16>
    %c0_20 = arith.constant 0 : index
    %c0_21 = arith.constant 0 : index
    %41 = vector.load %arg16[%c0_20, %c0_21] : memref<16x128xf32, #tpu.memory_space<vmem>>, vector<16x128xf32>
    %42 = arith.truncf %30 : vector<128x128xf32> to vector<128x128xbf16>
    %cst_22 = arith.constant dense<0.000000e+00> : vector<16x128xf32>
    %43 = tpu.matmul %40, %42, %cst_22 {dimension_numbers = #tpu.dot_dimension_numbers<[1], [0], [0], [1], [0, 0, 1, 1], [], []>} : vector<16x128xbf16>, vector<128x128xbf16>, vector<16x128xf32> -> vector<16x128xf32>
    %44 = arith.addf %41, %43 : vector<16x128xf32>
    %c0_23 = arith.constant 0 : index
    %c0_24 = arith.constant 0 : index
    %45 = vector.load %arg16[%c0_23, %c0_24] : memref<16x128xf32, #tpu.memory_space<vmem>>, vector<16x128xf32>
    tpu.vector_store %arg16[%c0_23, %c0_24], %44 {strides = array<i32>} : memref<16x128xf32, #tpu.memory_space<vmem>>, vector<16x128xf32>,
    %c1_i32 = arith.constant 1 : i32
    %46 = arith.cmpi eq, %arg1, %c1_i32 : i32
    %47 = arith.extui %46 : i1 to i32
    %c0_i32_25 = arith.constant 0 : i32
    %48 = arith.cmpi ne, %47, %c0_i32_25 : i32
    scf.if %48 {
      %c0_26 = arith.constant 0 : index
      %c0_27 = arith.constant 0 : index
      %49 = vector.load %arg16[%c0_26, %c0_27] : memref<16x128xf32, #tpu.memory_space<vmem>>, vector<16x128xf32>
      %c0_28 = arith.constant 0 : index
      %c0_29 = arith.constant 0 : index
      %50 = vector.load %arg6[%c0_28, %c0_29] : memref<16x1xf32, #tpu.memory_space<vmem>>, vector<16x1xf32>
      %51 = vector.broadcast %50 : vector<16x1xf32> to vector<16x128xf32>
      %52 = arith.mulf %49, %51 : vector<16x128xf32>
      %c0_30 = arith.constant 0 : index
      %c0_31 = arith.constant 0 : index
      %53 = vector.load %arg11[%c0_30, %c0_31] : memref<128x128xf32, #tpu.memory_space<vmem>>, vector<128x128xf32>
      %cst_32 = arith.constant dense<0.000000e+00> : vector<16x128xf32>
      %54 = tpu.matmul %52, %53, %cst_32 {dimension_numbers = #tpu.dot_dimension_numbers<[1], [0], [0], [1], [0, 0, 1, 1], [], []>} : vector<16x128xf32>, vector<128x128xf32>, vector<16x128xf32> -> vector<16x128xf32>
      %c0_33 = arith.constant 0 : index
      %c0_34 = arith.constant 0 : index
      %55 = vector.load %arg12[%c0_33, %c0_34] : memref<1x128xf32, #tpu.memory_space<vmem>>, vector<1x128xf32>
      %56 = vector.broadcast %55 : vector<1x128xf32> to vector<16x128xf32>
      %57 = arith.addf %54, %56 : vector<16x128xf32>
      %c0_35 = arith.constant 0 : index
      %c0_36 = arith.constant 0 : index
      %58 = vector.load %arg7[%c0_35, %c0_36] : memref<16x8xf32, #tpu.memory_space<vmem>>, vector<16x8xf32>
      %c0_37 = arith.constant 0 : index
      %c0_38 = arith.constant 0 : index
      %59 = vector.load %arg13[%c0_37, %c0_38] : memref<8x128xf32, #tpu.memory_space<vmem>>, vector<8x128xf32>
      %cst_39 = arith.constant dense<0.000000e+00> : vector<16x128xf32>
      %60 = tpu.matmul %58, %59, %cst_39 {dimension_numbers = #tpu.dot_dimension_numbers<[1], [0], [0], [1], [0, 0, 1, 1], [], []>} : vector<16x8xf32>, vector<8x128xf32>, vector<16x128xf32> -> vector<16x128xf32>
      %61 = arith.addf %60, %57 : vector<16x128xf32>
      %c0_40 = arith.constant 0 : index
      %c0_41 = arith.constant 0 : index
      %62 = vector.load %arg14[%c0_40, %c0_41] : memref<1x128xf32, #tpu.memory_space<vmem>>, vector<1x128xf32>
      %63 = vector.broadcast %62 : vector<1x128xf32> to vector<16x128xf32>
      %64 = arith.addf %61, %63 : vector<16x128xf32>
      %c0_42 = arith.constant 0 : index
      %c0_43 = arith.constant 0 : index
      %65 = vector.load %arg15[%c0_42, %c0_43] : memref<16x128xf32, #tpu.memory_space<vmem>>, vector<16x128xf32>
      tpu.vector_store %arg15[%c0_42, %c0_43], %64 {strides = array<i32>} : memref<16x128xf32, #tpu.memory_space<vmem>>, vector<16x128xf32>,
    } else {
    }
    return
  }
  func.func @transform_0(%arg0: i32, %arg1: i32) -> (i32, i32) {
    %c0_i32 = arith.constant 0 : i32
    %c0_i32_0 = arith.constant 0 : i32
    return %arg1, %c0_i32 : i32, i32
  }
  func.func @transform_1(%arg0: i32, %arg1: i32) -> (i32, i32) {
    %c0_i32 = arith.constant 0 : i32
    %c0_i32_0 = arith.constant 0 : i32
    return %arg1, %c0_i32 : i32, i32
  }
  func.func @transform_2(%arg0: i32, %arg1: i32) -> (i32, i32) {
    %c0_i32 = arith.constant 0 : i32
    %c0_i32_0 = arith.constant 0 : i32
    return %arg1, %c0_i32 : i32, i32
  }
  func.func @transform_3(%arg0: i32, %arg1: i32) -> (i32, i32) {
    %c0_i32 = arith.constant 0 : i32
    %c0_i32_0 = arith.constant 0 : i32
    return %c0_i32, %arg1 : i32, i32
  }
  func.func @transform_4(%arg0: i32, %arg1: i32) -> (i32, i32) {
    %c0_i32 = arith.constant 0 : i32
    %c0_i32_0 = arith.constant 0 : i32
    return %arg0, %c0_i32 : i32, i32
  }
  func.func @transform_5(%arg0: i32, %arg1: i32) -> (i32, i32) {
    %c0_i32 = arith.constant 0 : i32
    %c0_i32_0 = arith.constant 0 : i32
    return %arg0, %c0_i32 : i32, i32
  }
  func.func @transform_6(%arg0: i32, %arg1: i32) -> (i32, i32) {
    %c0_i32 = arith.constant 0 : i32
    %c0_i32_0 = arith.constant 0 : i32
    %c0_i32_1 = arith.constant 0 : i32
    return %c0_i32, %c0_i32_0 : i32, i32
  }
  func.func @transform_7(%arg0: i32, %arg1: i32) -> (i32, i32) {
    %c0_i32 = arith.constant 0 : i32
    %c0_i32_0 = arith.constant 0 : i32
    %c0_i32_1 = arith.constant 0 : i32
    return %c0_i32, %c0_i32_0 : i32, i32
  }
  func.func @transform_8(%arg0: i32, %arg1: i32) -> (i32, i32) {
    %c0_i32 = arith.constant 0 : i32
    %c0_i32_0 = arith.constant 0 : i32
    %c0_i32_1 = arith.constant 0 : i32
    return %c0_i32, %c0_i32_0 : i32, i32
  }
  func.func @transform_9(%arg0: i32, %arg1: i32) -> (i32, i32) {
    %c0_i32 = arith.constant 0 : i32
    %c0_i32_0 = arith.constant 0 : i32
    %c0_i32_1 = arith.constant 0 : i32
    return %c0_i32, %c0_i32_0 : i32, i32
  }
  func.func @transform_10(%arg0: i32, %arg1: i32) -> (i32, i32) {
    %c0_i32 = arith.constant 0 : i32
    %c0_i32_0 = arith.constant 0 : i32
    %c0_i32_1 = arith.constant 0 : i32
    return %c0_i32, %c0_i32_0 : i32, i32
  }
  func.func @transform_11(%arg0: i32, %arg1: i32) -> (i32, i32) {
    %c0_i32 = arith.constant 0 : i32
    %c0_i32_0 = arith.constant 0 : i32
    %c0_i32_1 = arith.constant 0 : i32
    return %c0_i32, %c0_i32_0 : i32, i32
  }
  func.func @transform_12(%arg0: i32, %arg1: i32) -> (i32, i32) {
    %c0_i32 = arith.constant 0 : i32
    %c0_i32_0 = arith.constant 0 : i32
    %c0_i32_1 = arith.constant 0 : i32
    return %c0_i32, %c0_i32_0 : i32, i32
  }
  func.func @transform_13(%arg0: i32, %arg1: i32) -> (i32, i32) {
    %c0_i32 = arith.constant 0 : i32
    %c0_i32_0 = arith.constant 0 : i32
    return %arg0, %c0_i32 : i32, i32
  }
}

</mosaic_0001>

<bundles_post_ra>
// kernel: tpu_custom_call.1
= control target key start
LH: loop header
LB: loop body
LE: loop exit
PB: predicated region body
PF: predicated region fallthrough
CT: control target
= control target key end

     0   :  { %18 = vsyncpa [#allocation4], 0  ;;  %s1827_s25 = smov 0   ;;  %s1829_s26 = smov 0   ;;  %s2415_s0 = inlined_call_operand.vmem [shape: f32[256,3], index: 0, kind: input, shape index: {}]   ;;  %s2416_s1 = inlined_call_operand.vmem [shape: f32[256,3], index: 1, kind: input, shape index: {}]   ;;  %s2417_s2 = inlined_call_operand.vmem [shape: f32[256,8], index: 2, kind: input, shape index: {}]   ;;  %s2418_s3 = inlined_call_operand.vmem [shape: s32[1,256], index: 3, kind: input, shape index: {}]   ;;  %s2419_s4 = inlined_call_operand.vmem [shape: f32[16,1], index: 4, kind: input, shape index: {}]   ;;  %s2420_s5 = inlined_call_operand.vmem [shape: f32[16,8], index: 5, kind: input, shape index: {}]   ;;  %s2421_s6 = inlined_call_operand.vmem [shape: f32[8,128], index: 6, kind: input, shape index: {}]   ;;  %s2422_s7 = inlined_call_operand.vmem [shape: f32[3,128], index: 7, kind: input, shape index: {}]   ;;  %s2423_s8 = inlined_call_operand.vmem [shape: f32[1,128], index: 8, kind: input, shape index: {}]   ;;  %s2424_s9 = inlined_call_operand.vmem [shape: f32[128,128], index: 9, kind: input, shape index: {}]   ;;  %s2425_s10 = inlined_call_operand.vmem [shape: f32[1,128], index: 10, kind: input, shape index: {}]   ;;  %s2426_s11 = inlined_call_operand.vmem [shape: f32[8,128], index: 11, kind: input, shape index: {}]   ;;  %s2427_s12 = inlined_call_operand.vmem [shape: f32[1,128], index: 12, kind: input, shape index: {}]   ;;  %s2428_s13 = inlined_call_operand.hbm [shape: f32[16,128], index: 13, kind: output, shape index: {}]  }
   0x1   :  { %s1831_s27 = smov 0  }
   0x2 LB: > { %2430 = sst [smem:[#allocation6_spill]] %s1745_s26  ;;  %s33_s29 = sadd.s32 1, %s1745_s26  ;;  %s1749_s27 = sphi %s1831_s27, %s24_s27   ;;  %s1745_s26 = sphi %s1829_s26, %s2434_s26   ;;  %s1741_s25 = sphi %s1827_s25, %s2433_s25  }
   0x3   : > { %p34_p0 = scmp.ge.s32.totalorder %s33_s29, 2  ;;  %p1520_p1 = scmp.ge.s32.totalorder %s1749_s27, 1 }
   0x4   : > { %p453_p2 = scmp.lt.s32.totalorder %s1749_s27, 3 }
   0x5   : > { %s2436_s29 = smov (%p34_p0, %s33_s29), 0 }
   0x6   : > { %2431 = sst [smem:[#allocation7_spill]] %s2436_s29  ;;  %p454_p3 = pnand %p1520_p1, %p453_p2 }
   0x7   : > { %s1521_s30 = sshll.u32 (!%p454_p3), %s1741_s25, 4  ;;  %p533_p4 = scmp.lt.s32.totalorder (!%p454_p3), %s1741_s25, 1 }
   0x8   : > { %457 = sbr.rel (%p454_p3) target bundleno = 818 (0x332), region = 72  ;;  %p516_p5 = scmp.lt.s32.totalorder (!%p454_p3), %s1521_s30, 31 }
   0x9   : > { %p1527_p6 = scmp.ne.s32.totalorder (!%p454_p3), %s1741_s25, 0 }
   0xd   : > { %s1851_s14 = scalar_select %p533_p4, %s1741_s25, 1 }
   0xe   : > { %s2438_s30 = smov (!%p516_p5, %s1521_s30), 31  ;;  %552 = sbr.rel (%p1527_p6) target bundleno = 22 (0x16), region = 76 }
   0xf   : > { %s535_s17 = scalar_lea.vmem %s2418_s3, %s1851_s14  ;;  %s1522_s18 = sshll.u32 %s2438_s30, 3 }
  0x10   : > { %s1860_s21 = scalar_lea.vmem %s2415_s0, %s1522_s18  ;;  %s1865_s24 = scalar_lea.vmem %s2416_s1, %s1522_s18 }
  0x11   : > { %s1870_s26 = scalar_lea.vmem %s2417_s2, %s1522_s18 }
  0x13   : > { %v1751_v0 = vmov 0.0  }
  0x14   : > { %553 = vst [vmem:[#allocation2] sm:$0xff] %v1751_v0 }
  0x15   : > { %554 = vst [vmem:[#allocation2 + $0x8] sm:$0xff] %v1751_v0 }
  0x16 PF: > { %v566_v1 = vld [vmem:[%s1865_s24 + $0x58] sm:$0xff]  ;;  %v565_v3 = vld [vmem:[%s1865_s24 + $0x50] sm:$0xff]  ;;  %v564_v6 = vld [vmem:[%s1865_s24 + $0x48] sm:$0xff]  ;;  %vm619_vm0 = vcmask 23552   ;;  %vm977_vm1 = vcmask 1042432   ;;  %vm1111_vm2 = vcmask 64512  }
  0x17   : > { %v582_v2 = vld [vmem:[%s1860_s21 + $0x58] sm:$0xff]  ;;  %v581_v5 = vld [vmem:[%s1860_s21 + $0x50] sm:$0xff]  ;;  %v580_v7 = vld [vmem:[%s1860_s21 + $0x48] sm:$0xff]  ;;  %p1565_p7 = scmp.ne.s32.totalorder %s1741_s25, 1 }
  0x18   : > { %v1876_v4 = vsub.f32 %v566_v1, %v582_v2  ;;  %v1881_v8 = vsub.f32 %v565_v3, %v581_v5  ;;  %v1883_v9 = vsub.f32 %v564_v6, %v580_v7  ;;  %v557_v10 = vld [vmem:[%s1865_s24 + $0x10] sm:$0xff]  ;;  %v556_v12 = vld [vmem:[%s1865_s24 + $0x8] sm:$0xff]  ;;  %v555_v16 = vld [vmem:[%s1865_s24] sm:$0xff] }
  0x19   : > { %v573_v11 = vld [vmem:[%s1860_s21 + $0x10] sm:$0xff]  ;;  %v572_v15 = vld [vmem:[%s1860_s21 + $0x8] sm:$0xff]  ;;  %v571_v17 = vld [vmem:[%s1860_s21] sm:$0xff] }
  0x1a   : > { %v614_v13 = vmul.f32 %v1876_v4, %v1876_v4  ;;  %v1890_v14 = vsub.f32 %v557_v10, %v573_v11  ;;  %v613_v18 = vmul.f32 %v1881_v8, %v1881_v8  ;;  %v612_v19 = vmul.f32 %v1883_v9, %v1883_v9  ;;  %v568_v28 = vld [vmem:[%s1865_s24 + $0x68] sm:$0xff]  ;;  %v558_v30 = vld [vmem:[%s1865_s24 + $0x18] sm:$0xff]  ;;  %v567_v32 = vld [vmem:[%s1865_s24 + $0x60] sm:$0xff] }
  0x1b   : > { %v1900_v21 = vsub.f32 %v556_v12, %v572_v15  ;;  %v1902_v22 = vsub.f32 %v555_v16, %v571_v17  ;;  %v584_v29 = vld [vmem:[%s1860_s21 + $0x68] sm:$0xff]  ;;  %v574_v31 = vld [vmem:[%s1860_s21 + $0x18] sm:$0xff]  ;;  %v583_v33 = vld [vmem:[%s1860_s21 + $0x60] sm:$0xff] }
  0x1c   : > { %v653_v20 = vsel %vm619_vm0, %v614_v13, 0.0  ;;  %v650_v23 = vsel %vm619_vm0, %v613_v18, 0.0  ;;  %v647_v24 = vsel %vm619_vm0, %v612_v19, 0.0  ;;  %v605_v25 = vmul.f32 %v1890_v14, %v1890_v14  ;;  %v569_v43 = vld [vmem:[%s1865_s24 + $0x70] sm:$0xff]  ;;  %v560_v44 = vld [vmem:[%s1865_s24 + $0x28] sm:$0xff]  ;;  %v559_v47 = vld [vmem:[%s1865_s24 + $0x20] sm:$0xff] }
  0x1d   : > { %654 = vadd.xlane.f32.xlu2 %v653_v20  ;;  %651 = vadd.xlane.f32.xlu1 %v650_v23  ;;  %v604_v26 = vmul.f32 %v1900_v21, %v1900_v21  ;;  %v603_v27 = vmul.f32 %v1902_v22, %v1902_v22  ;;  %v1919_v35 = vsub.f32 %v568_v28, %v584_v29  ;;  %v576_v45 = vld [vmem:[%s1860_s21 + $0x28] sm:$0xff]  ;;  %v585_v46 = vld [vmem:[%s1860_s21 + $0x70] sm:$0xff]  ;;  %v575_v48 = vld [vmem:[%s1860_s21 + $0x20] sm:$0xff] }
  0x1e   : > { %648 = vadd.xlane.f32.xlu0 %v647_v24  ;;  %v626_v34 = vsel %vm619_vm0, %v605_v25, 0.0  ;;  %v1923_v38 = vsub.f32 %v558_v30, %v574_v31  ;;  %v1925_v39 = vsub.f32 %v567_v32, %v583_v33  ;;  %v1940_v50 = vsub.f32 %v560_v44, %v576_v45  ;;  %v570_v58 = vld [vmem:[%s1865_s24 + $0x78] sm:$0xff]  ;;  %v561_v62 = vld [vmem:[%s1865_s24 + $0x30] sm:$0xff]  ;;  %v563_v12 = vld [vmem:[%s1865_s24 + $0x40] sm:$0xff] }
  0x1f   : > { %v623_v36 = vsel %vm619_vm0, %v604_v26, 0.0  ;;  %v620_v37 = vsel %vm619_vm0, %v603_v27, 0.0  ;;  %v616_v40 = vmul.f32 %v1919_v35, %v1919_v35  ;;  %v1944_v53 = vsub.f32 %v569_v43, %v585_v46  ;;  %v562_v59 = vld [vmem:[%s1865_s24 + $0x38] sm:$0xff]  ;;  %v577_v63 = vld [vmem:[%s1860_s21 + $0x30] sm:$0xff]  ;;  %v579_v13 = vld [vmem:[%s1860_s21 + $0x40] sm:$0xff] }
  0x20   : > { %v606_v41 = vmul.f32 %v1923_v38, %v1923_v38  ;;  %v615_v42 = vmul.f32 %v1925_v39, %v1925_v39  ;;  %v1946_v54 = vsub.f32 %v559_v47, %v575_v48  ;;  %v608_v55 = vmul.f32 %v1940_v50, %v1940_v50  ;;  %v578_v60 = vld [vmem:[%s1860_s21 + $0x38] sm:$0xff]  ;;  %v924_v26 = vld [vmem:[%s2422_s7] sm:$0x7] }
  0x21   : > { %v659_v49 = vsel %vm619_vm0, %v616_v40, 0.0  ;;  %v617_v56 = vmul.f32 %v1944_v53, %v1944_v53  ;;  %v586_v61 = vld [vmem:[%s1860_s21 + $0x78] sm:$0xff]  ;;  %v1961_v1 = vsub.f32 %v562_v59, %v578_v60  ;;  %v1967_v6 = vsub.f32 %v561_v62, %v577_v63  ;;  %1572 = vmatpush.msk.msra.mxu3 %vm977_vm1, %v924_v26  ;;  %1528 = vmatpush.msk.msra.mxu0 %vm977_vm1, %v924_v26  ;;  %v1103_v40 = vld [vmem:[%s1870_s26 + $0x48] sm:$0xff] }
  0x22   : > { %v629_v51 = vsel %vm619_vm0, %v606_v41, 0.0  ;;  %v656_v52 = vsel %vm619_vm0, %v615_v42, 0.0  ;;  %v607_v57 = vmul.f32 %v1946_v54, %v1946_v54  ;;  %v635_v0 = vsel %vm619_vm0, %v608_v55, 0.0 }
  0x23   : > { %v662_v2 = vsel %vm619_vm0, %v617_v56, 0.0  ;;  %v1965_v5 = vsub.f32 %v570_v58, %v586_v61  ;;  %v610_v7 = vmul.f32 %v1961_v1, %v1961_v1  ;;  %v609_v11 = vmul.f32 %v1967_v6, %v1967_v6 }
  0x24   : > { %v632_v3 = vsel %vm619_vm0, %v607_v57, 0.0  ;;  %v1980_v18 = vsub.f32 %v563_v12, %v579_v13  ;;  %v1094_v13 = vld [vmem:[%s1870_s26] sm:$0xff] }
  0x25   : > { %627 = vadd.xlane.f32.xlu2 %v626_v34  ;;  %624 = vadd.xlane.f32.xlu1 %v623_v36  ;;  %v618_v10 = vmul.f32 %v1965_v5, %v1965_v5  ;;  %v641_v15 = vsel %vm619_vm0, %v610_v7, 0.0  ;;  %v638_v17 = vsel %vm619_vm0, %v609_v11, 0.0  ;;  %v1110_v36 = vld [vmem:[%s2421_s6] sm:$0xff] }
  0x26   : > { %621 = vadd.xlane.f32.xlu0 %v620_v37  ;;  %v611_v19 = vmul.f32 %v1980_v18, %v1980_v18  ;;  %1573 = vmatpush.msra.mxu2 %v1110_v36 }
  0x27   : > { %v665_v16 = vsel %vm619_vm0, %v618_v10, 0.0  ;;  %1175 = vmatpush.msra.mxu1 %v1110_v36  ;;  %1554 = vmatmul.msk.f32.vlgmr.msra.gmra.mxu2 %vm1111_vm2, %v1103_v40 }
  0x28   : > { %v644_v20 = vsel %vm619_vm0, %v611_v19, 0.0  ;;  %1545 = vmatmul.msk.f32.vlgmr.msra.gmra.mxu1 %vm1111_vm2, %v1094_v13 }
  0x2d   : > { %660 = vadd.xlane.f32.xlu2 %v659_v49  ;;  %630 = vadd.xlane.f32.xlu1 %v629_v51 }
  0x2e   : > { %657 = vadd.xlane.f32.xlu0 %v656_v52 }
  0x35   : > { %636 = vadd.xlane.f32.xlu2 %v635_v0  ;;  %663 = vadd.xlane.f32.xlu1 %v662_v2 }
  0x36   : > { %633 = vadd.xlane.f32.xlu0 %v632_v3 }
  0x3d   : > { %642 = vadd.xlane.f32.xlu2 %v641_v15  ;;  %639 = vadd.xlane.f32.xlu1 %v638_v17  ;;  %v1104_v15 = vld [vmem:[%s1870_s26 + $0x50] sm:$0xff] }
  0x3e   : > { %666 = vadd.xlane.f32.xlu0 %v665_v16  ;;  %1555 = vmatmul.msk.f32.gmra.mxu2 %vm1111_vm2, %v1104_v15 }
  0x46   : > { %645 = vadd.xlane.f32.xlu0 %v644_v20 }
  0x90   : > { %v1985_v23 = vpop.xlane.xlu2 %654  ;;  %v1987_v24 = vpop.xlane.xlu1 %651 }
  0x91   : > { %v1989_v25 = vpop.xlane.xlu0 %648  ;;  %1628 = vrsqrt.f32 %v1987_v24  ;;  %vm795_vm5 = vcmp.eq.f32.partialorder %v1987_v24, inf  ;;  %vm797_vm6 = vcmp.eq.f32.partialorder %v1987_v24, 0.0  ;;  %vm807_vm9 = vcmp.eq.f32.partialorder %v1985_v23, inf }
  0x92   : > { %1630 = vrsqrt.f32 %v1989_v25  ;;  %vm783_vm3 = vcmp.eq.f32.partialorder %v1989_v25, inf  ;;  %v786_v3 = vand.u32 2147483648, %v1989_v25  ;;  %vm785_vm4 = vcmp.eq.f32.partialorder %v1989_v25, 0.0 }
  0x93   : > { %1632 = vrsqrt.f32 %v1985_v23  ;;  %vm809_vm12 = vcmp.eq.f32.partialorder %v1985_v23, 0.0 }
  0x97   : > { %v1629_v27 = vpop.eup %1628 }
  0x98   : > { %v1997_v28 = vpop.xlane.xlu2 %627  ;;  %v1631_v29 = vpop.eup %1630  ;;  %v789_v30 = vmul.f32 %v1629_v27, %v1987_v24 }
  0x99   : > { %1634 = vrsqrt.f32 %v1997_v28  ;;  %v2001_v31 = vpop.xlane.xlu1 %624  ;;  %v2003_v32 = vpop.xlane.xlu0 %621  ;;  %v777_v34 = vmul.f32 %v1631_v29, %v1989_v25  ;;  %vm699_vm13 = vcmp.eq.f32.partialorder %v1997_v28, inf  ;;  %vm701_vm14 = vcmp.eq.f32.partialorder %v1997_v28, 0.0 }
  0x9a   : > { %v2005_v33 = vpop.eup %1632  ;;  %1636 = vrsqrt.f32 %v2001_v31  ;;  %v790_v37 = vmul.f32 %v1629_v27, %v789_v30  ;;  %vm675_vm7 = vcmp.eq.f32.partialorder %v2003_v32, inf  ;;  %vm677_vm8 = vcmp.eq.f32.partialorder %v2003_v32, 0.0 }
  0x9b   : > { %1638 = vrsqrt.f32 %v2003_v32  ;;  %v778_v41 = vmul.f32 %v1631_v29, %v777_v34  ;;  %v801_v42 = vmul.f32 %v2005_v33, %v1985_v23  ;;  %vm687_vm10 = vcmp.eq.f32.partialorder %v2001_v31, inf }
  0x9c   : > { %v791_v43 = vmul.f32 0.5, %v790_v37  ;;  %vm689_vm11 = vcmp.eq.f32.partialorder %v2001_v31, 0.0 }
  0x9d   : > { %v779_v44 = vmul.f32 0.5, %v778_v41  ;;  %v802_v52 = vmul.f32 %v2005_v33, %v801_v42  ;;  %v798_v41 = vand.u32 2147483648, %v1987_v24 }
  0x9e   : > { %v792_v46 = vsub.f32 1.5, %v791_v43 }
  0x9f   : > { %v2017_v45 = vpop.eup %1634  ;;  %v780_v48 = vsub.f32 1.5, %v779_v44  ;;  %v803_v2 = vmul.f32 0.5, %v802_v52 }
  0xa0   : > { %v1637_v47 = vpop.eup %1636  ;;  %v2019_v49 = vpop.xlane.xlu2 %660  ;;  %v793_v58 = vmul.f32 %v1629_v27, %v792_v46  ;;  %v693_v61 = vmul.f32 %v2017_v45, %v1997_v28  ;;  %v1095_v46 = vld [vmem:[%s1870_s26 + $0x8] sm:$0xff] }
  0xa1   : > { %v1639_v51 = vpop.eup %1638  ;;  %v681_v55 = vmul.f32 %v1637_v47, %v2001_v31  ;;  %v2023_v56 = vpop.xlane.xlu1 %630  ;;  %v781_v59 = vmul.f32 %v1631_v29, %v780_v48  ;;  %1640 = vrsqrt.f32 %v2019_v49  ;;  %v804_v26 = vsub.f32 1.5, %v803_v2  ;;  %v1105_v48 = vld [vmem:[%s1870_s26 + $0x58] sm:$0xff]  ;;  %1546 = vmatmul.msk.f32.gmra.mxu1 %vm1111_vm2, %v1095_v46 }
  0xa2   : > { %v2025_v57 = vpop.xlane.xlu0 %657  ;;  %v669_v60 = vmul.f32 %v1639_v51, %v2003_v32  ;;  %1642 = vrsqrt.f32 %v2023_v56  ;;  %v794_v7 = vmul.f32 %v793_v58, %v1987_v24  ;;  %v694_v16 = vmul.f32 %v2017_v45, %v693_v61  ;;  %1556 = vmatmul.msk.f32.gmra.mxu2 %vm1111_vm2, %v1105_v48 }
  0xa3   : > { %v682_v62 = vmul.f32 %v1637_v47, %v681_v55  ;;  %v782_v63 = vmul.f32 %v781_v59, %v1989_v25  ;;  %1644 = vrsqrt.f32 %v2025_v57  ;;  %v805_v58 = vmul.f32 %v2005_v33, %v804_v26 }
  0xa4   : > { %v670_v0 = vmul.f32 %v1639_v51, %v669_v60  ;;  %v796_v37 = vsel %vm795_vm5, %v1987_v24, %v794_v7  ;;  %v695_v42 = vmul.f32 0.5, %v694_v16  ;;  %v901_v2 = vadd.f32 1.0, %v1883_v9 }
  0xa5   : > { %v683_v10 = vmul.f32 0.5, %v682_v62  ;;  %v784_v12 = vsel %vm783_vm3, %v1989_v25, %v782_v63  ;;  %v799_v55 = vsel %vm797_vm6, %v798_v41, %v796_v37  ;;  %v2077_v63 = vadd.f32 1.0, %v1881_v8 }
  0xa6   : > { %v671_v11 = vmul.f32 0.5, %v670_v0  ;;  %v787_v17 = vsel %vm785_vm4, %v786_v3, %v784_v12  ;;  %v696_v61 = vsub.f32 1.5, %v695_v42  ;;  %v870_v33 = vadd.f32 1e-07, %v799_v55 }
  0xa7   : > { %v2044_v19 = vpop.eup %1640  ;;  %v684_v30 = vsub.f32 1.5, %v683_v10  ;;  %v869_v36 = vadd.f32 1e-07, %v787_v17  ;;  %v678_v3 = vand.u32 2147483648, %v2003_v32  ;;  %v806_v8 = vmul.f32 %v805_v58, %v1985_v23 }
  0xa8   : > { %v672_v20 = vsub.f32 1.5, %v671_v11  ;;  %v2051_v29 = vpop.eup %1642  ;;  %v825_v43 = vmul.f32 %v2044_v19, %v2019_v49  ;;  %v2072_v24 = vpop.xlane.xlu2 %636  ;;  %v697_v15 = vmul.f32 %v2017_v45, %v696_v61  ;;  %v1106_v45 = vld [vmem:[%s1870_s26 + $0x60] sm:$0xff]  ;;  %v810_v41 = vand.u32 2147483648, %v1985_v23 }
  0xa9   : > { %v2047_v27 = vpop.xlane.xlu1 %663  ;;  %v2054_v40 = vpop.eup %1644  ;;  %v705_v52 = vmul.f32 %v2051_v29, %v2023_v56  ;;  %v685_v59 = vmul.f32 %v1637_v47, %v684_v30  ;;  %vm819_vm15 = vcmp.eq.f32.partialorder %v2025_v57, inf  ;;  %vm831_vm1 = vcmp.eq.f32.partialorder %v2019_v49, inf }
  0xaa   : > { %v2049_v25 = vpop.xlane.xlu0 %633  ;;  %v673_v34 = vmul.f32 %v1639_v51, %v672_v20  ;;  %1646 = vrsqrt.f32 %v2047_v27  ;;  %v813_v44 = vmul.f32 %v2054_v40, %v2025_v57  ;;  %v826_v62 = vmul.f32 %v2044_v19, %v825_v43  ;;  %1557 = vmatmul.msk.f32.gmra.mxu2 %vm1111_vm2, %v1106_v45 }
  0xab   : > { %1648 = vrsqrt.f32 %v2049_v25  ;;  %v706_v7 = vmul.f32 %v2051_v29, %v705_v52  ;;  %v686_v12 = vmul.f32 %v685_v59, %v2001_v31  ;;  %v808_v43 = vsel %vm807_vm9, %v1985_v23, %v806_v8 }
  0xac   : > { %v674_v51 = vmul.f32 %v673_v34, %v2003_v32  ;;  %v814_v60 = vmul.f32 %v2054_v40, %v813_v44  ;;  %1650 = vrcp.f32 %v869_v36  ;;  %v827_v16 = vmul.f32 0.5, %v826_v62  ;;  %v1096_v34 = vld [vmem:[%s1870_s26 + $0x10] sm:$0xff] }
  0xad   : > { %1652 = vrsqrt.f32 %v2072_v24  ;;  %v707_v36 = vmul.f32 0.5, %v706_v7  ;;  %v690_v44 = vand.u32 2147483648, %v2001_v31  ;;  %1547 = vmatmul.msk.f32.gmra.mxu1 %vm1111_vm2, %v1096_v34  ;;  %vm821_vm3 = vcmp.eq.f32.partialorder %v2025_v57, 0.0 }
  0xae   : > { %v815_v0 = vmul.f32 0.5, %v814_v60  ;;  %v676_v11 = vsel %vm675_vm7, %v2003_v32, %v674_v51  ;;  %v688_v32 = vsel %vm687_vm10, %v2001_v31, %v686_v12  ;;  %v698_v51 = vmul.f32 %v697_v15, %v1997_v28 }
  0xaf   : > { %v679_v30 = vsel %vm677_vm8, %v678_v3, %v676_v11  ;;  %v828_v52 = vsub.f32 1.5, %v827_v16  ;;  %v708_v60 = vsub.f32 1.5, %v707_v36  ;;  %v691_v23 = vsel %vm689_vm11, %v690_v44, %v688_v32 }
  0xb0   : > { %v2080_v47 = vpop.eup %1646  ;;  %v816_v20 = vsub.f32 1.5, %v815_v0  ;;  %v860_v46 = vadd.f32 1e-07, %v679_v30  ;;  %v811_v31 = vsel %vm809_vm12, %v810_v41, %v808_v43  ;;  %v892_v3 = vadd.f32 1.0, %v1902_v22 }
  0xb1   : > { %v837_v13 = vmul.f32 %v2080_v47, %v2047_v27  ;;  %v2093_v9 = vpop.eup %1648  ;;  %v2121_v61 = vpop.xlane.xlu1 %639  ;;  %v871_v7 = vadd.f32 1e-07, %v811_v31  ;;  %v829_v15 = vmul.f32 %v2044_v19, %v828_v52  ;;  %v709_v16 = vmul.f32 %v2051_v29, %v708_v60 }
  0xb2   : > { %v2085_v10 = vpop.xlane.xlu0 %666  ;;  %v1651_v17 = vpop.eup %1650  ;;  %v717_v26 = vmul.f32 %v2093_v9, %v2049_v25  ;;  %v817_v55 = vmul.f32 %v2054_v40, %v816_v20  ;;  %v702_v40 = vand.u32 2147483648, %v1997_v28  ;;  %v700_v20 = vsel %vm699_vm13, %v1997_v28, %v698_v51 }
  0xb3   : > { %1654 = vrsqrt.f32 %v2085_v10  ;;  %v917_v37 = vmul.f32 %v1651_v17, %v901_v2  ;;  %v838_v42 = vmul.f32 %v2080_v47, %v837_v13  ;;  %v2113_v48 = vpop.eup %1652  ;;  %v1097_v13 = vld [vmem:[%s1870_s26 + $0x18] sm:$0xff]  ;;  %v903_v28 = vadd.f32 1.0, %v1876_v4 }
  0xb4   : > { %1656 = vrcp.f32 %v870_v33  ;;  %v718_v58 = vmul.f32 %v2093_v9, %v717_v26  ;;  %v861_v33 = vadd.f32 1e-07, %v691_v23  ;;  %v818_v11 = vmul.f32 %v817_v55, %v2025_v57  ;;  %v1107_v26 = vld [vmem:[%s1870_s26 + $0x68] sm:$0xff]  ;;  %v1098_v23 = vld [vmem:[%s1870_s26 + $0x20] sm:$0xff] }
  0xb5   : > { %1538 = vmatmul.msk.f32.vlgmr.msra.gmra.mxu3 %vm619_vm0, %v917_v37  ;;  %1658 = vrcp.f32 %v860_v46  ;;  %v839_v0 = vmul.f32 0.5, %v838_v42  ;;  %v729_v12 = vmul.f32 %v2113_v48, %v2072_v24  ;;  %v703_v19 = vsel %vm701_vm14, %v702_v40, %v700_v20  ;;  %1548 = vmatmul.msk.f32.gmra.mxu1 %vm1111_vm2, %v1097_v13  ;;  %v2144_v37 = vpop.xlane.xlu2 %642  ;;  %v1108_v40 = vld [vmem:[%s1870_s26 + $0x70] sm:$0xff] }
  0xb6   : > { %v719_v8 = vmul.f32 0.5, %v718_v58  ;;  %1660 = vrsqrt.f32 %v2121_v61  ;;  %v820_v45 = vsel %vm819_vm15, %v2025_v57, %v818_v11  ;;  %1558 = vmatmul.msk.f32.gmra.mxu2 %vm1111_vm2, %v1107_v26  ;;  %v830_v41 = vmul.f32 %v829_v15, %v2019_v49 }
  0xb7   : > { %v840_v22 = vsub.f32 1.5, %v839_v0  ;;  %1662 = vrcp.f32 %v861_v33  ;;  %v710_v42 = vmul.f32 %v709_v16, %v2023_v56  ;;  %v822_v32 = vand.u32 2147483648, %v2025_v57 }
  0xb8   : > { %1664 = vrcp.f32 %v871_v7  ;;  %v720_v29 = vsub.f32 1.5, %v719_v8  ;;  %v862_v46 = vadd.f32 1e-07, %v703_v19  ;;  %v834_v4 = vand.u32 2147483648, %v2019_v49 }
  0xb9   : > { %v2119_v59 = vpop.eup %1654  ;;  %v841_v44 = vmul.f32 %v2080_v47, %v840_v22  ;;  %1666 = vrsqrt.f32 %v2144_v37  ;;  %v823_v52 = vsel %vm821_vm3, %v822_v32, %v820_v45  ;;  %vm711_vm4 = vcmp.eq.f32.partialorder %v2023_v56, inf }
  0xba   : > { %v1657_v62 = vpop.eup %1656  ;;  %v849_v2 = vmul.f32 %v2119_v59, %v2085_v10  ;;  %v721_v58 = vmul.f32 %v2093_v9, %v720_v29  ;;  %v893_v47 = vadd.f32 1.0, %v1900_v21  ;;  %v712_v0 = vsel %vm711_vm4, %v2023_v56, %v710_v42  ;;  %v2178_v11 = vpop.xlane.xlu0 %645 }
  0xbb   : > { %v918_v17 = vmul.f32 %v1657_v62, %v2077_v63  ;;  %v1659_v30 = vpop.eup %1658  ;;  %v730_v63 = vmul.f32 %v2113_v48, %v729_v12  ;;  %v872_v62 = vadd.f32 1e-07, %v823_v52  ;;  %v832_v33 = vsel %vm831_vm1, %v2019_v49, %v830_v41 }
  0xbc   : > { %v850_v34 = vmul.f32 %v2119_v59, %v849_v2  ;;  %v908_v36 = vmul.f32 %v1659_v30, %v892_v3  ;;  %v2152_v43 = vpop.eup %1660  ;;  %v714_v2 = vand.u32 2147483648, %v2023_v56  ;;  %v842_v9 = vmul.f32 %v841_v44, %v2047_v27 }
  0xbd   : > { %1539 = vmatmul.msk.f32.gmra.mxu3 %vm619_vm0, %v918_v17  ;;  %v1663_v55 = vpop.eup %1662  ;;  %v731_v60 = vmul.f32 0.5, %v730_v63  ;;  %v741_v57 = vmul.f32 %v2152_v43, %v2121_v61  ;;  %1668 = vrcp.f32 %v862_v46  ;;  %vm713_vm5 = vcmp.eq.f32.partialorder %v2023_v56, 0.0  ;;  %1549 = vmatmul.msk.f32.gmra.mxu1 %vm1111_vm2, %v1098_v23 }
  0xbe   : > { %1529 = vmatmul.msk.f32.vlgmr.msra.gmra.mxu0 %vm619_vm0, %v908_v36  ;;  %v851_v51 = vmul.f32 0.5, %v850_v34  ;;  %v1665_v31 = vpop.eup %1664  ;;  %1670 = vrcp.f32 %v872_v62  ;;  %vm833_vm6 = vcmp.eq.f32.partialorder %v2019_v49, 0.0  ;;  %vm843_vm7 = vcmp.eq.f32.partialorder %v2047_v27, inf  ;;  %1559 = vmatmul.msk.f32.gmra.mxu2 %vm1111_vm2, %v1108_v40 }
  0xbf   : > { %v919_v3 = vmul.f32 %v1665_v31, %v903_v28  ;;  %v909_v7 = vmul.f32 %v1663_v55, %v893_v47  ;;  %v715_v8 = vsel %vm713_vm5, %v714_v2, %v712_v0  ;;  %v835_v12 = vsel %vm833_vm6, %v834_v4, %v832_v33  ;;  %v2181_v13 = vpop.eup %1666  ;;  %v1109_v28 = vld [vmem:[%s1870_s26 + $0x78] sm:$0xff]  ;;  %v1100_v0 = vld [vmem:[%s1870_s26 + $0x30] sm:$0xff] }
  0xc0   : > { %v852_v21 = vsub.f32 1.5, %v851_v51  ;;  %v722_v15 = vmul.f32 %v721_v58, %v2049_v25  ;;  %v732_v56 = vsub.f32 1.5, %v731_v60  ;;  %v742_v49 = vmul.f32 %v2152_v43, %v741_v57 }
  0xc1   : > { %v873_v16 = vadd.f32 1e-07, %v835_v12  ;;  %v846_v17 = vand.u32 2147483648, %v2047_v27  ;;  %v904_v20 = vadd.f32 1.0, %v1925_v39  ;;  %1672 = vrsqrt.f32 %v2178_v11  ;;  %v1099_v39 = vld [vmem:[%s1870_s26 + $0x28] sm:$0xff] }
  0xc2   : > { %v853_v26 = vmul.f32 %v2119_v59, %v852_v21  ;;  %v863_v22 = vadd.f32 1e-07, %v715_v8  ;;  %v844_v30 = vsel %vm843_vm7, %v2047_v27, %v842_v9  ;;  %vm723_vm8 = vcmp.eq.f32.partialorder %v2049_v25, inf }
  0xc3   : > { %v1669_v34 = vpop.eup %1668  ;;  %v753_v19 = vmul.f32 %v2181_v13, %v2144_v37  ;;  %v894_v29 = vadd.f32 1.0, %v1890_v14  ;;  %vm845_vm9 = vcmp.eq.f32.partialorder %v2047_v27, 0.0  ;;  %v733_v59 = vmul.f32 %v2113_v48, %v732_v56 }
  0xc4   : > { %v1671_v63 = vpop.eup %1670  ;;  %v743_v36 = vmul.f32 0.5, %v742_v49  ;;  %1674 = vrcp.f32 %v873_v16  ;;  %v724_v45 = vsel %vm723_vm8, %v2049_v25, %v722_v15  ;;  %v726_v41 = vand.u32 2147483648, %v2049_v25  ;;  %v1101_v49 = vld [vmem:[%s1870_s26 + $0x38] sm:$0xff] }
  0xc5   : > { %1540 = vmatmul.msk.f32.gmra.mxu3 %vm619_vm0, %v919_v3  ;;  %v920_v42 = vmul.f32 %v1671_v63, %v904_v20  ;;  %v847_v32 = vsel %vm845_vm9, %v846_v17, %v844_v30  ;;  %v854_v44 = vmul.f32 %v853_v26, %v2085_v10  ;;  %1676 = vrcp.f32 %v863_v22  ;;  %1550 = vmatmul.msk.f32.gmra.mxu1 %vm1111_vm2, %v1099_v39  ;;  %v1102_v63 = vld [vmem:[%s1870_s26 + $0x40] sm:$0xff] }
  0xc6   : > { %1530 = vmatmul.msk.f32.gmra.mxu0 %vm619_vm0, %v909_v7  ;;  %vm725_vm10 = vcmp.eq.f32.partialorder %v2049_v25, 0.0  ;;  %vm855_vm11 = vcmp.eq.f32.partialorder %v2085_v10, inf  ;;  %v754_v14 = vmul.f32 %v2181_v13, %v753_v19  ;;  %v910_v27 = vmul.f32 %v1669_v34, %v894_v29  ;;  %1560 = vmatmul.msk.f32.gmra.mxu2 %vm1111_vm2, %v1109_v28 }
  0xc7   : > { %v727_v48 = vsel %vm725_vm10, %v726_v41, %v724_v45  ;;  %v2210_v46 = vpop.eup %1672  ;;  %v734_v4 = vmul.f32 %v733_v59, %v2072_v24  ;;  %v744_v51 = vsub.f32 1.5, %v743_v36  ;;  %v874_v52 = vadd.f32 1e-07, %v847_v32 }
  0xc8   : > { %vm735_vm12 = vcmp.eq.f32.partialorder %v2072_v24, inf  ;;  %v858_v25 = vand.u32 2147483648, %v2085_v10  ;;  %v905_v55 = vadd.f32 1.0, %v1919_v35  ;;  %v864_v60 = vadd.f32 1e-07, %v727_v48 }
  0xc9   : > { %v856_v47 = vsel %vm855_vm11, %v2085_v10, %v854_v44  ;;  %vm857_vm13 = vcmp.eq.f32.partialorder %v2085_v10, 0.0  ;;  %v738_v23 = vand.u32 2147483648, %v2072_v24  ;;  %v755_v31 = vmul.f32 0.5, %v754_v14 }
  0xca   : > { %v1675_v58 = vpop.eup %1674  ;;  %v765_v57 = vmul.f32 %v2210_v46, %v2178_v11  ;;  %v895_v62 = vadd.f32 1.0, %v1923_v38  ;;  %v745_v35 = vmul.f32 %v2152_v43, %v744_v51  ;;  %1678 = vrcp.f32 %v874_v52 }
  0xcb   : > { %v1677_v33 = vpop.eup %1676  ;;  %v736_v40 = vsel %vm735_vm12, %v2072_v24, %v734_v4  ;;  %vm737_vm14 = vcmp.eq.f32.partialorder %v2072_v24, 0.0  ;;  %v921_v10 = vmul.f32 %v1675_v58, %v905_v55  ;;  %v859_v2 = vsel %vm857_vm13, %v858_v25, %v856_v47  ;;  %v1177_v58 = vpop.f32.mrf.mxu1 }
  0xcc   : > { %1680 = vrcp.f32 %v864_v60  ;;  %v911_v9 = vmul.f32 %v1677_v33, %v895_v62  ;;  %v739_v38 = vsel %vm737_vm14, %v738_v23, %v736_v40  ;;  %v746_v3 = vmul.f32 %v745_v35, %v2121_v61  ;;  %v2273_v60 = vld [vmem:[%s2423_s8] ss:$0 sm:$0xff] }
  0xcd   : > { %1541 = vmatmul.msk.f32.gmra.mxu3 %vm619_vm0, %v920_v42  ;;  %1551 = vmatmul.msk.f32.gmra.mxu1 %vm1111_vm2, %v1100_v0  ;;  %v756_v43 = vsub.f32 1.5, %v755_v31  ;;  %v766_v21 = vmul.f32 %v2210_v46, %v765_v57  ;;  %v875_v7 = vadd.f32 1e-07, %v859_v2  ;;  %vm747_vm15 = vcmp.eq.f32.partialorder %v2121_v61, inf }
  0xce   : > { %1531 = vmatmul.msk.f32.gmra.mxu0 %vm619_vm0, %v910_v27  ;;  %v906_v24 = vadd.f32 1.0, %v1944_v53  ;;  %v865_v12 = vadd.f32 1e-07, %v739_v38  ;;  %vm749_vm1 = vcmp.eq.f32.partialorder %v2121_v61, 0.0  ;;  %v750_v15 = vand.u32 2147483648, %v2121_v61 }
  0xcf   : > { %v896_v56 = vadd.f32 1.0, %v1946_v54  ;;  %v748_v17 = vsel %vm747_vm15, %v2121_v61, %v746_v3  ;;  %v757_v20 = vmul.f32 %v2181_v13, %v756_v43  ;;  %v767_v26 = vmul.f32 0.5, %v766_v21 }
  0xd0   : > { %v1679_v8 = vpop.eup %1678  ;;  %1682 = vrcp.f32 %v875_v7  ;;  %v751_v30 = vsel %vm749_vm1, %v750_v15, %v748_v17  ;;  %vm759_vm3 = vcmp.eq.f32.partialorder %v2144_v37, inf  ;;  %v907_v61 = vadd.f32 1.0, %v1965_v5 }
  0xd1   : > { %v922_v22 = vmul.f32 %v1679_v8, %v906_v24  ;;  %1684 = vrcp.f32 %v865_v12  ;;  %v758_v34 = vmul.f32 %v757_v20, %v2144_v37  ;;  %v768_v54 = vsub.f32 1.5, %v767_v26 }
  0xd2   : > { %v1681_v16 = vpop.eup %1680  ;;  %v866_v19 = vadd.f32 1e-07, %v751_v30  ;;  %v762_v29 = vand.u32 2147483648, %v2144_v37  ;;  %v897_v39 = vadd.f32 1.0, %v1940_v50  ;;  %vm761_vm4 = vcmp.eq.f32.partialorder %v2144_v37, 0.0 }
  0xd3   : > { %v912_v53 = vmul.f32 %v1681_v16, %v896_v56  ;;  %v760_v36 = vsel %vm759_vm3, %v2144_v37, %v758_v34  ;;  %v769_v45 = vmul.f32 %v2210_v46, %v768_v54  ;;  %vm771_vm5 = vcmp.eq.f32.partialorder %v2178_v11, inf }
  0xd4   : > { %1686 = vrcp.f32 %v866_v19  ;;  %v763_v5 = vsel %vm761_vm4, %v762_v29, %v760_v36  ;;  %v774_v32 = vand.u32 2147483648, %v2178_v11  ;;  %v898_v37 = vadd.f32 1.0, %v1967_v6 }
  0xd5   : > { %1542 = vmatmul.msk.f32.gmra.mxu3 %vm619_vm0, %v921_v10  ;;  %1552 = vmatmul.msk.f32.gmra.mxu1 %vm1111_vm2, %v1101_v49  ;;  %v770_v42 = vmul.f32 %v769_v45, %v2178_v11  ;;  %v867_v50 = vadd.f32 1e-07, %v763_v5  ;;  %vm773_vm6 = vcmp.eq.f32.partialorder %v2178_v11, 0.0  ;;  %v899_v4 = vadd.f32 1.0, %v1961_v1 }
  0xd6   : > { %1532 = vmatmul.msk.f32.gmra.mxu0 %vm619_vm0, %v911_v9  ;;  %v1683_v13 = vpop.eup %1682  ;;  %v900_v6 = vadd.f32 1.0, %v1980_v18 }
  0xd7   : > { %v1685_v59 = vpop.eup %1684  ;;  %v923_v28 = vmul.f32 %v1683_v13, %v907_v61  ;;  %v772_v14 = vsel %vm771_vm5, %v2178_v11, %v770_v42  ;;  %1688 = vrcp.f32 %v867_v50  ;;  %v1204_v11 = vpop.f32.mrf.mxu2 }
  0xd8   : > { %v913_v41 = vmul.f32 %v1685_v59, %v897_v39  ;;  %v775_v48 = vsel %vm773_vm6, %v774_v32, %v772_v14 }
  0xd9   : > { %v868_v46 = vadd.f32 1e-07, %v775_v48 }
  0xda   : > { %v1687_v44 = vpop.eup %1686 }
  0xdb   : > { %v914_v27 = vmul.f32 %v1687_v44, %v898_v37  ;;  %1690 = vrcp.f32 %v868_v46 }
  0xdd   : > { %1543 = vmatmul.msk.f32.gmra.mxu3 %vm619_vm0, %v922_v22  ;;  %1553 = vmatmul.msk.f32.gmra.mxu1 %vm1111_vm2, %v1102_v63  ;;  %v1689_v51 = vpop.eup %1688 }
  0xde   : > { %1533 = vmatmul.msk.f32.gmra.mxu0 %vm619_vm0, %v912_v53  ;;  %v915_v52 = vmul.f32 %v1689_v51, %v899_v4 }
  0xdf   : > { %v2276_v23 = vpop.f32.mrf.mxu2 }
  0xe1   : > { %v1691_v25 = vpop.eup %1690 }
  0xe2   : > { %v916_v55 = vmul.f32 %v1691_v25, %v900_v6 }
  0xe5   : > { %1544 = vmatmul.msk.f32.gmra.mxu3 %vm619_vm0, %v923_v28 }
  0xe6   : > { %1534 = vmatmul.msk.f32.gmra.mxu0 %vm619_vm0, %v913_v41 }
  0xee   : > { %1535 = vmatmul.msk.f32.gmra.mxu0 %vm619_vm0, %v914_v27 }
  0xf6   : > { %1536 = vmatmul.msk.f32.gmra.mxu0 %vm619_vm0, %v915_v52 }
  0xfe   : > { %1537 = vmatmul.msk.f32.gmra.mxu0 %vm619_vm0, %v916_v55 }
 0x11e   : > { %v1180_v31 = vpop.f32.mrf.mxu1 }
 0x125   : > { %v1210_v9 = vpop.f32.mrf.mxu2 }
 0x12a   : > { %v2283_v38 = vpop.f32.mrf.mxu1 }
 0x12d   : > { %v1213_v56 = vpop.f32.mrf.mxu2 }
 0x132   : > { %v2292_v49 = vpop.f32.mrf.mxu1 }
 0x138   : > { %v1025_v47 = vpop.f32.mrf.mxu3 }
 0x139   : > { %v1026_v1 = vadd.f32 %v2273_v60, %v1025_v47  ;;  %v1216_v20 = vpop.f32.mrf.mxu2 }
 0x13a   : > { %v2296_v26 = vpop.f32.mrf.mxu1 }
 0x13b   : > { %v1071_v57 = vmul.f32 0.01, %v1026_v1  ;;  %vm1055_vm7 = vcmp.ge.f32.partialorder %v1026_v1, 0.0  ;;  %v998_v18 = vpop.f32.mrf.mxu0 }
 0x13c   : > { %v999_v0 = vadd.f32 %v2273_v60, %v998_v18 }
 0x13d   : > { %v1087_v62 = vsel %vm1055_vm7, %v1026_v1, %v1071_v57 }
 0x13e   : > { %v2279_v33 = vmul.f32 %v1204_v11, %v1087_v62  ;;  %v1062_v35 = vmul.f32 0.01, %v999_v0  ;;  %vm1046_vm0 = vcmp.ge.f32.partialorder %v999_v0, 0.0 }
 0x140   : > { %v1028_v40 = vpop.f32.mrf.mxu3  ;;  %v1078_v10 = vsel %vm1046_vm0, %v999_v0, %v1062_v35 }
 0x141   : > { %v2281_v2 = vmul.f32 %v1177_v58, %v1078_v10  ;;  %v1219_v34 = vpop.f32.mrf.mxu2  ;;  %v1029_v28 = vadd.f32 %v2273_v60, %v1028_v40 }
 0x142   : > { %v2298_v54 = vpop.f32.mrf.mxu1 }
 0x143   : > { %v1001_v3 = vpop.f32.mrf.mxu0  ;;  %v1072_v4 = vmul.f32 0.01, %v1029_v28  ;;  %vm1056_vm14 = vcmp.ge.f32.partialorder %v1029_v28, 0.0 }
 0x144   : > { %v1002_v43 = vadd.f32 %v2273_v60, %v1001_v3 }
 0x145   : > { %v1088_v11 = vsel %vm1056_vm14, %v1029_v28, %v1072_v4 }
 0x146   : > { %v1063_v21 = vmul.f32 0.01, %v1002_v43  ;;  %vm1047_vm8 = vcmp.ge.f32.partialorder %v1002_v43, 0.0  ;;  %v1235_v57 = vmul.f32 %v2276_v23, %v1088_v11 }
 0x148   : > { %v1031_v7 = vpop.f32.mrf.mxu3  ;;  %v1079_v24 = vsel %vm1047_vm8, %v1002_v43, %v1063_v21 }
 0x149   : > { %v2286_v8 = vmul.f32 %v1180_v31, %v1079_v24  ;;  %v1032_v59 = vadd.f32 %v2273_v60, %v1031_v7  ;;  %v1222_v50 = vpop.f32.mrf.mxu2 }
 0x14a   : > { %v1195_v32 = vpop.f32.mrf.mxu1 }
 0x14b   : > { %v2288_v12 = vpop.f32.mrf.mxu0  ;;  %v1259_v15 = vpack.c.bf16 %v2286_v8, %v2281_v2  ;;  %v1073_v44 = vmul.f32 0.01, %v1032_v59  ;;  %vm1057_vm13 = vcmp.ge.f32.partialorder %v1032_v59, 0.0 }
 0x14d   : > { %v1089_v25 = vsel %vm1057_vm13, %v1032_v59, %v1073_v44 }
 0x14e   : > { %v1236_v58 = vmul.f32 %v1210_v9, %v1089_v25 }
 0x150   : > { %v1034_v16 = vpop.f32.mrf.mxu3  ;;  %v1264_v18 = vpack.c.bf16 %v1236_v58, %v1235_v57 }
 0x151   : > { %v1035_v29 = vadd.f32 %v2273_v60, %v1034_v16 }
 0x152   : > { %v1198_v31 = vpop.f32.mrf.mxu1 }
 0x153   : > { %v2294_v17 = vpop.f32.mrf.mxu0  ;;  %v1074_v41 = vmul.f32 0.01, %v1035_v29  ;;  %vm1058_vm12 = vcmp.ge.f32.partialorder %v1035_v29, 0.0 }
 0x154   : > { %v1008_v7 = vadd.f32 %v2273_v60, %v2294_v17 }
 0x155   : > { %v1090_v51 = vsel %vm1058_vm12, %v1035_v29, %v1074_v41 }
 0x156   : > { %v1237_v55 = vmul.f32 %v1213_v56, %v1090_v51  ;;  %vm1049_vm6 = vcmp.ge.f32.partialorder %v1008_v7, 0.0 }
 0x158   : > { %v1037_v22 = vpop.f32.mrf.mxu3 }
 0x159   : > { %v1038_v19 = vadd.f32 %v2273_v60, %v1037_v22  ;;  %v1005_v22 = vadd.f32 %v2273_v60, %v2288_v12 }
 0x15a   : > { %v1201_v23 = vpop.f32.mrf.mxu1 }
 0x15b   : > { %v1010_v53 = vpop.f32.mrf.mxu0  ;;  %v1075_v36 = vmul.f32 0.01, %v1038_v19  ;;  %vm1059_vm10 = vcmp.ge.f32.partialorder %v1038_v19, 0.0  ;;  %v1064_v17 = vmul.f32 0.01, %v1005_v22  ;;  %vm1048_vm7 = vcmp.ge.f32.partialorder %v1005_v22, 0.0 }
 0x15c   : > { %v1011_v9 = vadd.f32 %v2273_v60, %v1010_v53 }
 0x15d   : > { %v1091_v14 = vsel %vm1059_vm10, %v1038_v19, %v1075_v36 }
 0x15e   : > { %v1238_v52 = vmul.f32 %v1216_v20, %v1091_v14  ;;  %vm1050_vm5 = vcmp.ge.f32.partialorder %v1011_v9, 0.0 }
 0x160   : > { %v1040_v30 = vpop.f32.mrf.mxu3  ;;  %v1265_v1 = vpack.c.bf16 %v1238_v52, %v1237_v55 }
 0x161   : > { %v1041_v61 = vadd.f32 %v2273_v60, %v1040_v30  ;;  %v1066_v30 = vmul.f32 0.01, %v1011_v9 }
 0x163   : > { %v1013_v13 = vpop.f32.mrf.mxu0  ;;  %v1076_v39 = vmul.f32 0.01, %v1041_v61  ;;  %vm1060_vm9 = vcmp.ge.f32.partialorder %v1041_v61, 0.0 }
 0x164   : > { %v1014_v40 = vadd.f32 %v2273_v60, %v1013_v13  ;;  %v1065_v13 = vmul.f32 0.01, %v1008_v7 }
 0x165   : > { %v1092_v5 = vsel %vm1060_vm9, %v1041_v61, %v1076_v39  ;;  %v1082_v39 = vsel %vm1050_vm5, %v1011_v9, %v1066_v30 }
 0x166   : > { %v1239_v48 = vmul.f32 %v1219_v34, %v1092_v5  ;;  %v1067_v24 = vmul.f32 0.01, %v1014_v40  ;;  %vm1051_vm4 = vcmp.ge.f32.partialorder %v1014_v40, 0.0  ;;  %v1229_v12 = vmul.f32 %v2296_v26, %v1082_v39  ;;  %v1257_v26 = vld [vmem:[#allocation2] sm:$0xff] }
 0x168   : > { %v1043_v63 = vpop.f32.mrf.mxu3  ;;  %v1083_v19 = vsel %vm1051_vm4, %v1014_v40, %v1067_v24 }
 0x169   : > { %v1044_v45 = vadd.f32 %v2273_v60, %v1043_v63  ;;  %v1241_v63 = vlaneseq  ;;  %v1230_v59 = vmul.f32 %v2298_v54, %v1083_v19 }
 0x16b   : > { %v1077_v42 = vmul.f32 0.01, %v1044_v45  ;;  %vm1061_vm11 = vcmp.ge.f32.partialorder %v1044_v45, 0.0  ;;  %v1016_v37 = vpop.f32.mrf.mxu0  ;;  %v1242_v28 = vshrl.u32 %v1241_v63, 7  ;;  %v1261_v41 = vpack.c.bf16 %v1230_v59, %v1229_v12 }
 0x16c   : > { %v1017_v0 = vadd.f32 %v2273_v60, %v1016_v37  ;;  %v1258_v37 = vld [vmem:[#allocation2 + $0x8] sm:$0xff] }
 0x16d   : > { %v1093_v27 = vsel %vm1061_vm11, %v1044_v45, %v1077_v42  ;;  %v1080_v45 = vsel %vm1048_vm7, %v1005_v22, %v1064_v17  ;;  %v1243_v42 = vadd.s32 8, %v1242_v28 }
 0x16e   : > { %v1240_v46 = vmul.f32 %v1222_v50, %v1093_v27  ;;  %v1068_v43 = vmul.f32 0.01, %v1017_v0  ;;  %vm1052_vm3 = vcmp.ge.f32.partialorder %v1017_v0, 0.0  ;;  %v1227_v5 = vmul.f32 %v2283_v38, %v1080_v45  ;;  %v1627_v50 = vld [vmem:[%s535_s17] ss:$0 sm:$0xff] }
 0x16f   : > { %vm1250_vm0 = vcmp.eq.s32.totalorder %v1627_v50, %v1242_v28  ;;  %vm1251_vm8 = vcmp.eq.s32.totalorder %v1627_v50, %v1243_v42 }
 0x170   : > { %v1266_v6 = vpack.c.bf16 %v1240_v46, %v1239_v48  ;;  %v1084_v34 = vsel %vm1052_vm3, %v1017_v0, %v1068_v43  ;;  %vm1563_vm9 = vmpackc.low %vm1251_vm8, %vm1250_vm0 }
 0x171   : > { %v1231_v29 = vmul.f32 %v1195_v32, %v1084_v34 }
 0x172   : > { %1267 = vmatpush.bf16.msrb.mxu2 %v1266_v6 }
 0x173   : > { %v1019_v47 = vpop.f32.mrf.mxu0 }
 0x174   : > { %v1020_v62 = vadd.f32 %v2273_v60, %v1019_v47 }
 0x176   : > { %1268 = vmatpush.bf16.msrb.mxu2 %v1265_v1  ;;  %v1069_v10 = vmul.f32 0.01, %v1020_v62  ;;  %vm1053_vm15 = vcmp.ge.f32.partialorder %v1020_v62, 0.0 }
 0x178   : > { %v1085_v56 = vsel %vm1053_vm15, %v1020_v62, %v1069_v10 }
 0x179   : > { %v1232_v53 = vmul.f32 %v1198_v31, %v1085_v56 }
 0x17a   : > { %1269 = vmatpush.bf16.msrb.mxu2 %v1264_v18 }
 0x17b   : > { %v1022_v35 = vpop.f32.mrf.mxu0  ;;  %v1262_v36 = vpack.c.bf16 %v1232_v53, %v1231_v29 }
 0x17c   : > { %v1023_v3 = vadd.f32 %v2273_v60, %v1022_v35  ;;  %v1081_v60 = vsel %vm1049_vm6, %v1008_v7, %v1065_v13 }
 0x17e   : > { %v1070_v21 = vmul.f32 0.01, %v1023_v3  ;;  %vm1054_vm1 = vcmp.ge.f32.partialorder %v1023_v3, 0.0 }
 0x180   : > { %v1086_v16 = vsel %vm1054_vm1, %v1023_v3, %v1070_v21 }
 0x181   : > { %v1233_v20 = vmul.f32 %v1201_v23, %v1086_v16 }
 0x183   : > { %v1263_v61 = vpack.c.bf16 %v2279_v33, %v1233_v20  ;;  %v1228_v33 = vmul.f32 %v2292_v49, %v1081_v60  ;;  %v1752_v49 = vmov 1.0|1.0  }
 0x185   : > { %1270 = vmatpush.bf16.msrb.mxu2 %v1263_v61  ;;  %v1260_v54 = vpack.c.bf16 %v1228_v33, %v1227_v5 }
 0x189   : > { %1271 = vmatpush.bf16.msrb.mxu2 %v1262_v36 }
 0x18d   : > { %1272 = vmatpush.bf16.msrb.mxu2 %v1261_v41 }
 0x191   : > { %1273 = vmatpush.bf16.msrb.mxu2 %v1260_v54 }
 0x195   : > { %1274 = vmatpush.bf16.msrb.mxu2 %v1259_v15 }
 0x198   : > { %1564 = vmatmul.msk.bf16.vlgmr.msrb.gmra.mxu2 %vm1563_vm9, %v1752_v49 }
 0x21b   : > { %v1276_v38 = vpop.f32.mrf.mxu2 }
 0x21c   : > { %v1281_v32 = vadd.f32 %v1276_v38, %v1257_v26 }
 0x21e   : > { %1283 = vst [vmem:[#allocation2] sm:$0xff] %v1281_v32 }
 0x222   : > { %1288 = sbr.rel (%p1565_p7) target bundleno = 811 (0x32b), region = 80 }
 0x223   : > { %v1278_v44 = vpop.f32.mrf.mxu2 }
 0x224   : > { %v1282_v14 = vadd.f32 %v1278_v44, %v1258_v37 }
 0x226   : > { %1284 = vst [vmem:[#allocation2 + $0x8] sm:$0xff] %v1282_v14 }
 0x227   : > { %v1292_v27 = vld [vmem:[%s2419_s4 + $0x8] sm:$0xff]  ;;  %v1320_v2 = vld [vmem:[%s2424_s9 + $0x78] sm:$0xff]  ;;  %v1753_v8 = vmov 0   ;;  %v1319_v15 = vld [vmem:[%s2424_s9 + $0x70] sm:$0xff] }
 0x228   : > { %1692 = vset.pattern.permute.xlu0 %v1753_v8  ;;  %1574 = vmatpush.msra.mxu2 %v1320_v2  ;;  %v1318_v48 = vld [vmem:[%s2424_s9 + $0x68] sm:$0xff]  ;;  %v1317_v46 = vld [vmem:[%s2424_s9 + $0x60] sm:$0xff]  ;;  %v1316_v4 = vld [vmem:[%s2424_s9 + $0x58] sm:$0xff] }
 0x229   : > { %1300 = vperm.xlu0 %1692, %v1292_v27   ;;  %1325 = vmatpush.msra.mxu0 %v1320_v2  ;;  %v1291_v51 = vld [vmem:[%s2419_s4] sm:$0xff]  ;;  %v1315_v52 = vld [vmem:[%s2424_s9 + $0x50] sm:$0xff]  ;;  %v1314_v6 = vld [vmem:[%s2424_s9 + $0x48] sm:$0xff] }
 0x22a   : > { %1575 = vmatpush.msra.mxu2 %v1319_v15  ;;  %v1313_v25 = vld [vmem:[%s2424_s9 + $0x40] sm:$0xff]  ;;  %v1312_v55 = vld [vmem:[%s2424_s9 + $0x38] sm:$0xff]  ;;  %v1311_v11 = vld [vmem:[%s2424_s9 + $0x30] sm:$0xff] }
 0x22b   : > { %1326 = vmatpush.msra.mxu0 %v1319_v15  ;;  %v1310_v58 = vld [vmem:[%s2424_s9 + $0x28] sm:$0xff]  ;;  %v1309_v47 = vld [vmem:[%s2424_s9 + $0x20] sm:$0xff]  ;;  %v1308_v1 = vld [vmem:[%s2424_s9 + $0x18] sm:$0xff] }
 0x22c   : > { %1576 = vmatpush.msra.mxu2 %v1318_v48  ;;  %v1307_v31 = vld [vmem:[%s2424_s9 + $0x10] sm:$0xff]  ;;  %v1306_v57 = vld [vmem:[%s2424_s9 + $0x8] sm:$0xff]  ;;  %v1305_v18 = vld [vmem:[%s2424_s9] sm:$0xff] }
 0x22d   : > { %1327 = vmatpush.msra.mxu0 %v1318_v48  ;;  %v1350_v62 = vld [vmem:[%s2426_s11] sm:$0xff]  ;;  %v1349_v35 = vld [vmem:[%s2420_s5 + $0x8] sm:$0xff] }
 0x22e   : > { %1577 = vmatpush.msra.mxu2 %v1317_v46  ;;  %1372 = vmatpush.msra.mxu1 %v1350_v62  ;;  %v1348_v0 = vld [vmem:[%s2420_s5] sm:$0xff]  ;;  %v1290_v40 = vld [vmem:[#allocation2 + $0x8] sm:$0xff] }
 0x22f   : > { %1328 = vmatpush.msra.mxu0 %v1317_v46  ;;  %1566 = vmatmul.msk.f32.vlgmr.msra.gmra.mxu1 %vm1111_vm2, %v1348_v0  ;;  %v1289_v9 = vld [vmem:[#allocation2] sm:$0xff] }
 0x230   : > { %1578 = vmatpush.msra.mxu2 %v1316_v4  ;;  %v1693_v7 = vld [vmem:[%s2425_s10] ss:$0 sm:$0xff] }
 0x231   : > { %1295 = vperm.xlu0 %1692, %v1291_v51   ;;  %1329 = vmatpush.msra.mxu0 %v1316_v4  ;;  %v1694_v20 = vld [vmem:[%s2427_s12] ss:$0 sm:$0xff] }
 0x232   : > { %1579 = vmatpush.msra.mxu2 %v1315_v52 }
 0x233   : > { %1330 = vmatpush.msra.mxu0 %v1315_v52 }
 0x234   : > { %1580 = vmatpush.msra.mxu2 %v1314_v6 }
 0x235   : > { %1331 = vmatpush.msra.mxu0 %v1314_v6 }
 0x236   : > { %1581 = vmatpush.msra.mxu2 %v1313_v25 }
 0x237   : > { %1332 = vmatpush.msra.mxu0 %v1313_v25  ;;  %1567 = vmatmul.msk.f32.gmra.mxu1 %vm1111_vm2, %v1349_v35 }
 0x238   : > { %1582 = vmatpush.msra.mxu2 %v1312_v55 }
 0x239   : > { %1333 = vmatpush.msra.mxu0 %v1312_v55 }
 0x23a   : > { %1583 = vmatpush.msra.mxu2 %v1311_v11 }
 0x23b   : > { %1334 = vmatpush.msra.mxu0 %v1311_v11 }
 0x23c   : > { %1584 = vmatpush.msra.mxu2 %v1310_v58 }
 0x23d   : > { %1335 = vmatpush.msra.mxu0 %v1310_v58 }
 0x23e   : > { %1585 = vmatpush.msra.mxu2 %v1309_v47 }
 0x23f   : > { %1336 = vmatpush.msra.mxu0 %v1309_v47 }
 0x240   : > { %1586 = vmatpush.msra.mxu2 %v1308_v1 }
 0x241   : > { %1337 = vmatpush.msra.mxu0 %v1308_v1 }
 0x242   : > { %1587 = vmatpush.msra.mxu2 %v1307_v31 }
 0x243   : > { %1338 = vmatpush.msra.mxu0 %v1307_v31 }
 0x244   : > { %1588 = vmatpush.msra.mxu2 %v1306_v57 }
 0x245   : > { %1339 = vmatpush.msra.mxu0 %v1306_v57 }
 0x246   : > { %1589 = vmatpush.msra.mxu2 %v1305_v18 }
 0x247   : > { %1340 = vmatpush.msra.mxu0 %v1305_v18 }
 0x29b   : > { %v1301_v10 = vpop.permute.xlu0 %1300 }
 0x29c   : > { %v1304_v3 = vmul.f32 %v1301_v10, %v1290_v40 }
 0x29e   : > { %1344 = vmatmul.f32.vlgmr.msra.gmra.mxu2 %v1304_v3 }
 0x2a3   : > { %v1296_v43 = vpop.permute.xlu0 %1295 }
 0x2a4   : > { %v1303_v21 = vmul.f32 %v1296_v43, %v1289_v9 }
 0x2a6   : > { %1341 = vmatmul.f32.vlgmr.msra.gmra.mxu0 %v1303_v21 }
 0x2ac   : > { %v1374_v23 = vpop.f32.mrf.mxu1 }
 0x2b4   : > { %v1377_v56 = vpop.f32.mrf.mxu1 }
 0x321   : > { %v1345_v24 = vpop.f32.mrf.mxu2 }
 0x322   : > { %v1346_v16 = vadd.f32 %v1693_v7, %v1345_v24 }
 0x323   : > { %v1342_v22 = vpop.f32.mrf.mxu0 }
 0x324   : > { %v1343_v30 = vadd.f32 %v1693_v7, %v1342_v22  ;;  %v1378_v34 = vadd.f32 %v1377_v56, %v1346_v16 }
 0x326   : > { %v1375_v53 = vadd.f32 %v1374_v23, %v1343_v30  ;;  %v1385_v61 = vadd.f32 %v1694_v20, %v1378_v34 }
 0x328   : > { %v1384_v13 = vadd.f32 %v1694_v20, %v1375_v53  ;;  %1387 = vst [vmem:[#allocation3 + $0x8] sm:$0xff] %v1385_v61 }
 0x32a   : > { %1386 = vst [vmem:[#allocation3] sm:$0xff] %v1384_v13 }
 0x32b PF: > { %s2432_s18 = sadd.s32 4294967295, %s1749_s27   ;;  %s1398_s17 = sshll.u32 %s2428_s13, 4  ;;  %s1399_s17 = int_to_ptr.hbm [resolvable:$true] %s1398_s17 }
 0x32c   : > { %p1594_p8 = scmp.eq.s32.totalorder %s2432_s18, 1  ;;  %s1754_s20 = smov [#allocation3]  }
 0x32d   : > { %s1396_s21 = sshll.u32 %s1754_s20, 4  ;;  %s1755_s22 = smov 128   ;;  %s1397_s21 = int_to_ptr.vmem [resolvable:$true] %s1396_s21 }
 0x32e   : > { %s1756_s23 = smov 8  }
 0x32f   : > { %1591 = dma.vmem_to_hbm [thread:$0]  (%p1594_p8), %s1397_s21, 256, %s1399_s17, [#allocation4], %s1755_s22, %s1755_s22, %s1756_s23  }
 0x330   : > { %1736 = dma.done.wait (%p1594_p8), [#allocation4], 256  }
 0x331   : > { %1738 = vsyncadd (%p1594_p8), [#allocation4], 4294967040 }
 0x332 PF: > { %s24_s27 = sadd.s32 1, %s1749_s27   ;;  %s2433_s25 = sld [smem:[#allocation6_spill]] }
 0x333   : > { %p21_p9 = scmp.ge.s32.totalorder %s24_s27, 4   ;;  %s2434_s26 = sld [smem:[#allocation7_spill]] }
 0x335   :  { %23 = sbr.rel (!%p21_p9) target bundleno = 2 (0x2), region = 123 }
 0x33a   :  { %1415 = vsyncpa [#allocation4], 1 }
 0x33b   :  { %1417 = vsyncpa [#allocation4 + $0x1], 1 }

</bundles_post_ra>
